<compile_context>
chip_gen: v7x
topology: tpu7x:2x2x1
jax: 0.10.0
libtpu: 0.0.40
codegen_flags: <defaults>
</compile_context>

<pallas_src>
import functools
import math

import jax
import jax.numpy as jnp
from jax.experimental import pallas as pl
from jax.experimental.pallas import tpu as pltpu


# ----------------------------- Pallas kernel --------------------------------
def _striped_lstm_kernel(x_ref, wx_ref, wh_ref, b_ref, h0_ref, c0_ref,
                         h1_ref, c1_ref, *, gate_width):
    """One stripe-group per grid step.

    x_ref  : (B, I)                 input (any float dtype)
    wx_ref : (I, 4*GS)              packed input weights, gate-major columns
    wh_ref : (GS, 4*GS)             dense group-local block-diagonal W_hh^T
    b_ref  : (1, 4*GS)              pre-summed bias (f32)
    h0/c0  : (B, GS)                recurrent state (kept f32 across steps)
    h1/c1  : (B, GS)                outputs
    """
    GS = gate_width
    cdt = wx_ref.dtype                      # matmul operand dtype (bf16 or f32)

    x = x_ref[...].astype(cdt)              # (B, I)
    h0 = h0_ref[...]                        # (B, GS), stays f32 outside kernel

    # Two full-width MXU matmuls with f32 accumulation (the block-diagonal
    # recurrence is folded into wh_ref, so there are no per-stripe matmuls).
    gates = jnp.dot(x, wx_ref[...], preferred_element_type=jnp.float32)
    gates = gates + jnp.dot(h0.astype(cdt), wh_ref[...],
                            preferred_element_type=jnp.float32)
    gates = gates + b_ref[...].astype(jnp.float32)          # (B, 4*GS)

    # Gate-major column packing -> 4 contiguous lane-dense slabs.
    i_g = jax.nn.sigmoid(gates[:, 0 * GS:1 * GS])
    f_g = jax.nn.sigmoid(gates[:, 1 * GS:2 * GS])
    g_g = jnp.tanh(gates[:, 2 * GS:3 * GS])
    o_g = jax.nn.sigmoid(gates[:, 3 * GS:4 * GS])

    c1 = f_g * c0_ref[...].astype(jnp.float32) + i_g * g_g
    h1 = o_g * jnp.tanh(c1)

    # Single lane-dense full-block store per output.
    h1_ref[...] = h1.astype(h1_ref.dtype)
    c1_ref[...] = c1.astype(c1_ref.dtype)


# -------------------------- sizing / budgeting --------------------------------
def _vmem_limit_bytes():
    """Per-generation VMEM request: physical capacity minus headroom."""
    try:
        cap = int(pltpu.get_tpu_info().vmem_capacity_bytes)
    except Exception:
        cap = 64 * 1024 * 1024          # conservative fallback (v7x per-core size)
    return (cap * 3) // 4               # headroom for Mosaic internal scratch


def _pick_stripes_per_block(num_stripes, stripe_size, input_size, batch,
                            weight_itemsize, state_itemsize, vmem_budget,
                            target_gate_lanes=1024):
    """Largest useful 128-aligned stripe group that fits the VMEM budget."""
    S, I, B = stripe_size, input_size, batch

    def vmem_need(g):
        gs = g * S
        four_gs = 4 * gs
        need = 2 * (I + gs) * four_gs * weight_itemsize   # w_x + w_h, double-buffered
        need += 2 * B * I * state_itemsize                # x (double-buffered even if static)
        need += 2 * four_gs * 4                           # bias (f32)
        need += 2 * 4 * B * gs * state_itemsize           # h0, c0, h1, c1 blocks
        need += 6 * B * four_gs * 4                       # f32 gates / activation live values
        return need

    divisors = [g for g in range(1, num_stripes) if num_stripes % g == 0]
    aligned = [g for g in divisors if (g * S) % 128 == 0]
    fitting = [g for g in aligned if vmem_need(g) <= vmem_budget]
    if fitting:
        reach = [g for g in fitting if 4 * g * S >= target_gate_lanes]
        pool = reach or fitting
        even = [g for g in pool if (num_stripes // g) % 2 == 0]   # v7x: 2 TCs like even grids
        pool = even or pool
        # Smallest group that reaches the lane target (most grid parallelism,
        # least block-diagonal padding); otherwise the largest fitting group.
        return min(pool) if reach else max(pool)
    # Full-coverage fallback: single group, full-dim blocks (always layout-legal).
    return num_stripes


# ------------------------------ weight packing --------------------------------
def striped_lstm_pack(w_ih, w_hh, b_ih, b_hh, *, batch_size,
                      weights_dtype=jnp.bfloat16, state_dtype=jnp.float32,
                      stripes_per_block=None):
    """One-time layout plumbing.  Call ONCE, outside any timestep loop.

    Returns (w_x, w_h, b):
      w_x : (I, 4H)                  x-projection, gate-major columns per group
      w_h : (num_groups, G*S, 4*G*S) dense group-local block-diagonal W_hh^T
      b   : (1, 4H)                  b_ih + b_hh, gate-major per group, f32
    """
    ns, four_s, I = w_ih.shape
    S = four_s // 4

    G = stripes_per_block or _pick_stripes_per_block(
        ns, S, I, batch_size,
        jnp.dtype(weights_dtype).itemsize, jnp.dtype(state_dtype).itemsize,
        _vmem_limit_bytes())
    assert ns % G == 0
    num_groups = ns // G
    GS = G * S

    # Input projection: columns ordered [group][gate][stripe-in-group][s].
    w5 = w_ih.reshape(num_groups, G, 4, S, I)
    w_x = jnp.transpose(w5, (4, 0, 2, 1, 3)).reshape(I, 4 * ns * S)

    # Recurrent projection: per group a dense (G*S, 4*G*S) block-diagonal
    # matrix so the recurrence folds into one full-width matmul.
    wh5 = w_hh.reshape(num_groups, G, 4, S, S)          # (g, j, k, s_out, s_in)
    eye = jnp.eye(G, dtype=w_hh.dtype)
    w_h = jnp.einsum('gjkos,jl->gjsklo', wh5, eye).reshape(num_groups, GS, 4 * GS)

    # Pre-summed bias, gate-major per group, kept f32.
    b = (b_ih + b_hh).reshape(num_groups, G, 4, S)
    b = jnp.transpose(b, (0, 2, 1, 3)).reshape(1, 4 * ns * S).astype(jnp.float32)

    return w_x.astype(weights_dtype), w_h.astype(weights_dtype), b


# ------------------------------- wrappers --------------------------------------
def striped_lstm_cell_packed(x, h0, c0, w_x, w_h, b):
    """Forward pass using pre-packed weights (use this inside lax.scan)."""
    B, I = x.shape
    num_groups, GS, four_gs = w_h.shape
    H = num_groups * GS
    assert h0.shape == (B, H) and c0.shape == (B, H)
    assert w_x.shape == (I, 4 * H) and b.shape == (1, 4 * H)
    out_dtype = h0.dtype

    flops = 2 * B * 4 * H * (I + GS)
    bytes_accessed = int(
        x.size * x.dtype.itemsize
        + w_x.size * w_x.dtype.itemsize
        + w_h.size * w_h.dtype.itemsize
        + b.size * 4
        + (h0.size + c0.size) * h0.dtype.itemsize
        + 2 * B * H * jnp.dtype(out_dtype).itemsize)
    cost = pl.CostEstimate(flops=flops, transcendentals=5 * B * H,
                           bytes_accessed=bytes_accessed)

    kernel = functools.partial(_striped_lstm_kernel, gate_width=GS)

    h1, c1 = pl.pallas_call(
        kernel,
        out_shape=(jax.ShapeDtypeStruct((B, H), out_dtype),
                   jax.ShapeDtypeStruct((B, H), out_dtype)),
        grid_spec=pltpu.PrefetchScalarGridSpec(
            num_scalar_prefetch=0,
            grid=(num_groups,),
            in_specs=[
                pl.BlockSpec((B, I),             lambda i: (0, 0)),     # x (shared)
                pl.BlockSpec((I, four_gs),       lambda i: (0, i)),     # w_x group cols
                pl.BlockSpec((None, GS, four_gs), lambda i: (i, 0, 0)), # w_h group
                pl.BlockSpec((1, four_gs),       lambda i: (0, i)),     # bias group
                pl.BlockSpec((B, GS),            lambda i: (0, i)),     # h0 stripes
                pl.BlockSpec((B, GS),            lambda i: (0, i)),     # c0 stripes
            ],
            out_specs=[
                pl.BlockSpec((B, GS), lambda i: (0, i)),                # h1 stripes
                pl.BlockSpec((B, GS), lambda i: (0, i)),                # c1 stripes
            ],
        ),
        compiler_params=pltpu.CompilerParams(
            dimension_semantics=("parallel",),
            vmem_limit_bytes=_vmem_limit_bytes()),
        cost_estimate=cost,
    )(x, w_x, w_h, b, h0, c0)

    return h1, c1


def striped_lstm_cell(x, h0, c0, w_ih, w_hh, b_ih, b_hh, *,
                      weights_dtype=jnp.bfloat16, stripes_per_block=None):
    """Convenience one-shot entry point (packs weights, then calls the kernel).

    For multi-timestep use, call `striped_lstm_pack` once and then
    `striped_lstm_cell_packed` per step.
    """
    packed = striped_lstm_pack(w_ih, w_hh, b_ih, b_hh,
                               batch_size=x.shape[0],
                               weights_dtype=weights_dtype,
                               state_dtype=h0.dtype,
                               stripes_per_block=stripes_per_block)
    return striped_lstm_cell_packed(x, h0, c0, *packed)


# ------------------------- pure-JAX reference ---------------------------------
def striped_lstm_cell_ref(x, h0, c0, w_ih, w_hh, b_ih, b_hh):
    num_stripes, four_s, _ = w_ih.shape
    S = four_s // 4
    h1_list, c1_list = [], []
    for i in range(num_stripes):
        h0s = h0[:, i * S:(i + 1) * S]
        c0s = c0[:, i * S:(i + 1) * S]
        gates = (x @ w_ih[i].T + b_ih[i, 0]
                 + h0s @ w_hh[i].T + b_hh[i, 0])
        ig = jax.nn.sigmoid(gates[:, 0 * S:1 * S])
        fg = jax.nn.sigmoid(gates[:, 1 * S:2 * S])
        gg = jnp.tanh(gates[:, 2 * S:3 * S])
        og = jax.nn.sigmoid(gates[:, 3 * S:4 * S])
        c1s = fg * c0s + ig * gg
        h1s = og * jnp.tanh(c1s)
        h1_list.append(h1s)
        c1_list.append(c1s)
    return jnp.concatenate(h1_list, axis=1), jnp.concatenate(c1_list, axis=1)


# --------------------------------- main ---------------------------------------
if __name__ == "__main__":
    batch = 2
    input_size = 16
    hidden_size = 32
    num_stripes = 4
    S = hidden_size // num_stripes          # stripe_size = 8

    key = jax.random.PRNGKey(0)
    keys = jax.random.split(key, 8)

    # deterministic param init (same distributions as reset_parameters):
    # kaiming_uniform(a=sqrt(5)) on a 2-D weight == U(-1/sqrt(fan_in), 1/sqrt(fan_in))
    bound_ih = 1.0 / math.sqrt(input_size)
    bound_hh = 1.0 / math.sqrt(S)
    bound_b = 1.0 / math.sqrt(input_size)   # bias bound uses fan_in of weight_ih

    w_ih = jax.random.uniform(keys[0], (num_stripes, 4 * S, input_size),
                              jnp.float32, -bound_ih, bound_ih)
    w_hh = jax.random.uniform(keys[1], (num_stripes, 4 * S, S),
                              jnp.float32, -bound_hh, bound_hh)
    b_ih = jax.random.uniform(keys[2], (num_stripes, 1, 4 * S),
                              jnp.float32, -bound_b, bound_b)
    b_hh = jax.random.uniform(keys[3], (num_stripes, 1, 4 * S),
                              jnp.float32, -bound_b, bound_b)

    x = jax.random.normal(keys[4], (batch, input_size), jnp.float32)
    h0 = jax.random.normal(keys[5], (batch, hidden_size), jnp.float32)
    c0 = jax.random.normal(keys[6], (batch, hidden_size), jnp.float32)

    h1_ref, c1_ref = striped_lstm_cell_ref(x, h0, c0, w_ih, w_hh, b_ih, b_hh)

    # (1) f32 path, weights pre-packed ONCE outside the jitted step (the way a
    #     lax.scan over timesteps should use it) — strict check.
    packed_f32 = striped_lstm_pack(w_ih, w_hh, b_ih, b_hh, batch_size=batch,
                                   weights_dtype=jnp.float32)
    step_f32 = jax.jit(striped_lstm_cell_packed)
    h1, c1 = step_f32(x, h0, c0, *packed_f32)
    jax.block_until_ready((h1, c1))
    assert h1.shape == (batch, hidden_size) and c1.shape == (batch, hidden_size)
    assert jnp.allclose(h1, h1_ref, atol=1e-5, rtol=1e-5)
    assert jnp.allclose(c1, c1_ref, atol=1e-5, rtol=1e-5)

    # (2) default production path: bf16 matmul operands, f32 accumulation and
    #     gate math, f32 recurrent state — loose check.
    cell_bf16 = jax.jit(striped_lstm_cell)
    h1b, c1b = cell_bf16(x, h0, c0, w_ih, w_hh, b_ih, b_hh)
    jax.block_until_ready((h1b, c1b))
    assert jnp.allclose(h1b.astype(jnp.float32), h1_ref, atol=1e-1, rtol=1e-1)
    assert jnp.allclose(c1b.astype(jnp.float32), c1_ref, atol=1e-1, rtol=1e-1)

    print("KERNEL_OK")
</pallas_src>

<mosaic_0001>
module attributes {stable_mosaic.version = 11 : i64} {
  func.func @_striped_lstm_kernel(%arg0: i32, %arg1: memref<2x16xf32, #tpu.memory_space<vmem>>, %arg2: memref<16x128xf32, #tpu.memory_space<vmem>>, %arg3: memref<1x32x128xf32, #tpu.memory_space<vmem>>, %arg4: memref<1x128xf32, #tpu.memory_space<vmem>>, %arg5: memref<2x32xf32, #tpu.memory_space<vmem>>, %arg6: memref<2x32xf32, #tpu.memory_space<vmem>>, %arg7: memref<2x32xf32, #tpu.memory_space<vmem>>, %arg8: memref<2x32xf32, #tpu.memory_space<vmem>>) attributes {dimension_semantics = [#tpu.dimension_semantics<parallel>], iteration_bounds = array<i64: 1>, scalar_prefetch = 0 : i64, scratch_operands = 0 : i64, tpu.core_type = #tpu.core_type<tc>, window_params = [{pipeline_mode = #tpu.pipeline_mode<synchronous>, transform_indices = @transform_0, window_bounds = array<i64: 2, 16>}, {transform_indices = @transform_1, window_bounds = array<i64: 16, 128>}, {transform_indices = @transform_2, window_bounds = array<i64: 1, 32, 128>}, {transform_indices = @transform_3, window_bounds = array<i64: 1, 128>}, {transform_indices = @transform_4, window_bounds = array<i64: 2, 32>}, {transform_indices = @transform_5, window_bounds = array<i64: 2, 32>}, {transform_indices = @transform_6, window_bounds = array<i64: 2, 32>}, {transform_indices = @transform_7, window_bounds = array<i64: 2, 32>}]} {
    %c0 = arith.constant 0 : index
    %c0_0 = arith.constant 0 : index
    %0 = vector.load %arg1[%c0, %c0_0] : memref<2x16xf32, #tpu.memory_space<vmem>>, vector<2x16xf32>
    %c0_1 = arith.constant 0 : index
    %c0_2 = arith.constant 0 : index
    %1 = vector.load %arg5[%c0_1, %c0_2] : memref<2x32xf32, #tpu.memory_space<vmem>>, vector<2x32xf32>
    %c0_3 = arith.constant 0 : index
    %c0_4 = arith.constant 0 : index
    %2 = vector.load %arg2[%c0_3, %c0_4] : memref<16x128xf32, #tpu.memory_space<vmem>>, vector<16x128xf32>
    %cst = arith.constant dense<0.000000e+00> : vector<2x128xf32>
    %3 = tpu.matmul %0, %2, %cst {dimension_numbers = #tpu.dot_dimension_numbers<[1], [0], [0], [1], [0, 0, 1, 1], [], []>} : vector<2x16xf32>, vector<16x128xf32>, vector<2x128xf32> -> vector<2x128xf32>
    %c0_5 = arith.constant 0 : index
    %c0_6 = arith.constant 0 : index
    %c0_7 = arith.constant 0 : index
    %4 = vector.load %arg3[%c0_5, %c0_6, %c0_7] : memref<1x32x128xf32, #tpu.memory_space<vmem>>, vector<1x32x128xf32>
    %5 = vector.shape_cast %4 : vector<1x32x128xf32> to vector<32x128xf32>
    %cst_8 = arith.constant dense<0.000000e+00> : vector<2x128xf32>
    %6 = tpu.matmul %1, %5, %cst_8 {dimension_numbers = #tpu.dot_dimension_numbers<[1], [0], [0], [1], [0, 0, 1, 1], [], []>} : vector<2x32xf32>, vector<32x128xf32>, vector<2x128xf32> -> vector<2x128xf32>
    %7 = arith.addf %3, %6 : vector<2x128xf32>
    %c0_9 = arith.constant 0 : index
    %c0_10 = arith.constant 0 : index
    %8 = vector.load %arg4[%c0_9, %c0_10] : memref<1x128xf32, #tpu.memory_space<vmem>>, vector<1x128xf32>
    %9 = vector.broadcast %8 : vector<1x128xf32> to vector<2x128xf32>
    %10 = arith.addf %7, %9 : vector<2x128xf32>
    %11 = vector.extract_strided_slice %10 {offsets = [0, 0], sizes = [2, 32], strides = [1, 1]} : vector<2x128xf32> to vector<2x32xf32>
    %12 = arith.negf %11 : vector<2x32xf32>
    %13 = math.exp %12 : vector<2x32xf32>
    %cst_11 = arith.constant 1.000000e+00 : f32
    %14 = vector.broadcast %cst_11 : f32 to vector<2x32xf32>
    %15 = arith.addf %14, %13 : vector<2x32xf32>
    %16 = arith.divf %14, %15 : vector<2x32xf32>
    %17 = vector.extract_strided_slice %10 {offsets = [0, 32], sizes = [2, 32], strides = [1, 1]} : vector<2x128xf32> to vector<2x32xf32>
    %18 = arith.negf %17 : vector<2x32xf32>
    %19 = math.exp %18 : vector<2x32xf32>
    %cst_12 = arith.constant 1.000000e+00 : f32
    %20 = vector.broadcast %cst_12 : f32 to vector<2x32xf32>
    %21 = arith.addf %20, %19 : vector<2x32xf32>
    %22 = arith.divf %20, %21 : vector<2x32xf32>
    %23 = vector.extract_strided_slice %10 {offsets = [0, 64], sizes = [2, 32], strides = [1, 1]} : vector<2x128xf32> to vector<2x32xf32>
    %24 = math.tanh %23 : vector<2x32xf32>
    %25 = vector.extract_strided_slice %10 {offsets = [0, 96], sizes = [2, 32], strides = [1, 1]} : vector<2x128xf32> to vector<2x32xf32>
    %26 = arith.negf %25 : vector<2x32xf32>
    %27 = math.exp %26 : vector<2x32xf32>
    %cst_13 = arith.constant 1.000000e+00 : f32
    %28 = vector.broadcast %cst_13 : f32 to vector<2x32xf32>
    %29 = arith.addf %28, %27 : vector<2x32xf32>
    %30 = arith.divf %28, %29 : vector<2x32xf32>
    %c0_14 = arith.constant 0 : index
    %c0_15 = arith.constant 0 : index
    %31 = vector.load %arg6[%c0_14, %c0_15] : memref<2x32xf32, #tpu.memory_space<vmem>>, vector<2x32xf32>
    %32 = arith.mulf %22, %31 : vector<2x32xf32>
    %33 = arith.mulf %16, %24 : vector<2x32xf32>
    %34 = arith.addf %32, %33 : vector<2x32xf32>
    %35 = math.tanh %34 : vector<2x32xf32>
    %36 = arith.mulf %30, %35 : vector<2x32xf32>
    %c0_16 = arith.constant 0 : index
    %c0_17 = arith.constant 0 : index
    %37 = vector.load %arg7[%c0_16, %c0_17] : memref<2x32xf32, #tpu.memory_space<vmem>>, vector<2x32xf32>
    tpu.vector_store %arg7[%c0_16, %c0_17], %36 {strides = array<i32>} : memref<2x32xf32, #tpu.memory_space<vmem>>, vector<2x32xf32>,
    %c0_18 = arith.constant 0 : index
    %c0_19 = arith.constant 0 : index
    %38 = vector.load %arg8[%c0_18, %c0_19] : memref<2x32xf32, #tpu.memory_space<vmem>>, vector<2x32xf32>
    tpu.vector_store %arg8[%c0_18, %c0_19], %34 {strides = array<i32>} : memref<2x32xf32, #tpu.memory_space<vmem>>, vector<2x32xf32>,
    return
  }
  func.func @transform_0(%arg0: i32) -> (i32, i32) {
    %c0_i32 = arith.constant 0 : i32
    %c0_i32_0 = arith.constant 0 : i32
    %c0_i32_1 = arith.constant 0 : i32
    return %c0_i32, %c0_i32_0 : i32, i32
  }
  func.func @transform_1(%arg0: i32) -> (i32, i32) {
    %c0_i32 = arith.constant 0 : i32
    %c0_i32_0 = arith.constant 0 : i32
    return %c0_i32, %arg0 : i32, i32
  }
  func.func @transform_2(%arg0: i32) -> (i32, i32, i32) {
    %c0_i32 = arith.constant 0 : i32
    %c0_i32_0 = arith.constant 0 : i32
    %c0_i32_1 = arith.constant 0 : i32
    return %arg0, %c0_i32, %c0_i32_0 : i32, i32, i32
  }
  func.func @transform_3(%arg0: i32) -> (i32, i32) {
    %c0_i32 = arith.constant 0 : i32
    %c0_i32_0 = arith.constant 0 : i32
    return %c0_i32, %arg0 : i32, i32
  }
  func.func @transform_4(%arg0: i32) -> (i32, i32) {
    %c0_i32 = arith.constant 0 : i32
    %c0_i32_0 = arith.constant 0 : i32
    return %c0_i32, %arg0 : i32, i32
  }
  func.func @transform_5(%arg0: i32) -> (i32, i32) {
    %c0_i32 = arith.constant 0 : i32
    %c0_i32_0 = arith.constant 0 : i32
    return %c0_i32, %arg0 : i32, i32
  }
  func.func @transform_6(%arg0: i32) -> (i32, i32) {
    %c0_i32 = arith.constant 0 : i32
    %c0_i32_0 = arith.constant 0 : i32
    return %c0_i32, %arg0 : i32, i32
  }
  func.func @transform_7(%arg0: i32) -> (i32, i32) {
    %c0_i32 = arith.constant 0 : i32
    %c0_i32_0 = arith.constant 0 : i32
    return %c0_i32, %arg0 : i32, i32
  }
}

</mosaic_0001>

<bundles_post_ra>
// kernel: striped_lstm_cell_packed.1
= control target key start
LH: loop header
LB: loop body
LE: loop exit
PB: predicated region body
PF: predicated region fallthrough
CT: control target
= control target key end

     0   :  { %13 = vsyncpa [#allocation3], 0  ;;  %s608_s0 = inlined_call_operand.hbm [shape: f32[2,16], index: 0, kind: input, shape index: {}]   ;;  %s609_s1 = inlined_call_operand.hbm [shape: f32[16,128], index: 1, kind: input, shape index: {}]   ;;  %s610_s2 = inlined_call_operand.hbm [shape: f32[1,32,128], index: 2, kind: input, shape index: {}]   ;;  %s611_s3 = inlined_call_operand.vmem [shape: f32[1,128], index: 3, kind: input, shape index: {}]   ;;  %s612_s4 = inlined_call_operand.vmem [shape: f32[2,32], index: 4, kind: input, shape index: {}]   ;;  %s613_s5 = inlined_call_operand.vmem [shape: f32[2,32], index: 5, kind: input, shape index: {}]   ;;  %s614_s6 = inlined_call_operand.hbm [shape: f32[2,32], index: 6, kind: output, shape index: {0}]   ;;  %s615_s7 = inlined_call_operand.hbm [shape: f32[2,32], index: 7, kind: output, shape index: {1}]  }
   0x1   :  { %14 = vsyncpa [#allocation6], 0 }
   0x2   :  { %15 = vsyncpa [#allocation4], 0 }
   0x3   :  { %16 = vsyncpa [#allocation10], 0  ;;  %s478_s24 = smov [#allocation5]   ;;  %s360_s28 = scalar_lea.hbm %s609_s1, 256 }
   0x4   :  { %s32_s25 = sshll.u32 %s478_s24, 4  ;;  %p361_p0 = scmp.ne.s32.totalorder %s609_s1, %s360_s28  ;;  %s33_s25 = int_to_ptr.vmem [resolvable:$true] %s32_s25 }
   0x5   :  { %p364_p1 = scmp.lt.u32.totalorder %s360_s28, %s609_s1 }
   0x7   :  { %p366_p2 = pnand %p364_p1, %p361_p0 }
   0x9   :  { %369 = shalt.err (!%p366_p2)
}
   0xa   :  { %s370_s10 = scalar_lea.vmem %s33_s25, 256  ;;  %p375_p4 = scmp.lt.s32.totalorder %s33_s25, %s33_s25 }
   0xb   :  { %p371_p3 = scmp.ne.s32.totalorder %s33_s25, %s370_s10  ;;  %p376_p5 = scmp.lt.s32.totalorder %s370_s10, %s370_s10 }
   0xd   :  { %p377_p6 = por %p376_p5, %p375_p4 }
   0xf   :  { %p378_p7 = pnand %p377_p6, %p371_p3 }
  0x11   :  { %381 = shalt.err (!%p378_p7)
}
  0x12   :  { %s479_s11 = smov 128   ;;  %s480_s12 = smov 8  }
  0x13   :  { %38 = dma.hbm_to_vmem [thread:$0]  %s609_s1, 256, %s33_s25, [#allocation6], %s479_s11, %s479_s11, %s480_s12  }
  0x14   :  { %s481_s15 = smov [#allocation2]   ;;  %s482_s17 = smov [#allocation7]  }
  0x15   :  { %s23_s16 = sshll.u32 %s481_s15, 4  ;;  %s44_s18 = sshll.u32 %s482_s17, 4  ;;  %s24_s16 = int_to_ptr.vmem [resolvable:$true] %s23_s16  ;;  %s45_s18 = int_to_ptr.vmem [resolvable:$true] %s44_s18 }
  0x16   :  { %s382_s21 = scalar_lea.hbm %s608_s0, 32 }
  0x17   :  { %p383_p8 = scmp.ne.s32.totalorder %s608_s0, %s382_s21  ;;  %p386_p9 = scmp.lt.u32.totalorder %s382_s21, %s608_s0 }
  0x19   :  { %p388_p10 = pnand %p386_p9, %p383_p8 }
  0x1b   :  { %391 = shalt.err (!%p388_p10)
}
  0x1c   :  { %s392_s1 = scalar_lea.vmem %s24_s16, 32  ;;  %p397_p12 = scmp.lt.s32.totalorder %s24_s16, %s24_s16 }
  0x1d   :  { %p393_p11 = scmp.ne.s32.totalorder %s24_s16, %s392_s1  ;;  %p398_p13 = scmp.lt.s32.totalorder %s392_s1, %s392_s1 }
  0x1f   :  { %p399_p0 = por %p398_p13, %p397_p12 }
  0x21   :  { %p400_p1 = pnand %p399_p0, %p393_p11 }
  0x23   :  { %403 = shalt.err (!%p400_p1)
}
  0x24   :  { %26 = dma.hbm_to_vmem [thread:$0]  %s608_s0, 32, %s24_s16, [#allocation3]  }
  0x25   :  { %s404_s30 = scalar_lea.hbm %s610_s2, 512 }
  0x26   :  { %p405_p2 = scmp.ne.s32.totalorder %s610_s2, %s404_s30  ;;  %p408_p3 = scmp.lt.u32.totalorder %s404_s30, %s610_s2 }
  0x28   :  { %p410_p4 = pnand %p408_p3, %p405_p2 }
  0x2a   :  { %413 = shalt.err (!%p410_p4)
}
  0x2b   :  { %s414_s14 = scalar_lea.vmem %s45_s18, 512  ;;  %p419_p6 = scmp.lt.s32.totalorder %s45_s18, %s45_s18 }
  0x2c   :  { %p415_p5 = scmp.ne.s32.totalorder %s45_s18, %s414_s14  ;;  %p420_p7 = scmp.lt.s32.totalorder %s414_s14, %s414_s14 }
  0x2e   :  { %p421_p8 = por %p420_p7, %p419_p6 }
  0x30   :  { %p422_p9 = pnand %p421_p8, %p415_p5 }
  0x32   :  { %425 = shalt.err (!%p422_p9)
}
  0x33   :  { %50 = dma.hbm_to_vmem [thread:$0]  %s610_s2, 512, %s45_s18, [#allocation6], %s479_s11, %s479_s11, %s480_s12  }
  0x34   :  { %470 = dma.done.wait [#allocation3], 32  }
  0x35   :  { %471 = vsyncadd [#allocation3], 4294967264 }
  0x36   :  { %472 = dma.done.wait [#allocation6], 768  }
  0x37   :  { %473 = vsyncadd [#allocation6], 4294966528  ;;  %v483_v0 = vmov 0.0|0.0   ;;  %vm484_vm0 = vmmov 0   ;;  %v485_v1 = vmov 0.0   ;;  %v70_v2 = vld [vmem:[#allocation7] sm:$0xff] }
  0x38   :  { %330 = vmatprep.subr.bf16.mxu0 %v483_v0  ;;  %336 = vmatprep.subr.bf16.mxu1 %v483_v0  ;;  %v71_v3 = vld [vmem:[#allocation7 + $0x8] sm:$0xff]  ;;  %v68_v4 = vld [vmem:[#allocation5] sm:$0xff]  ;;  %v69_v6 = vld [vmem:[#allocation5 + $0x8] sm:$0xff]  ;;  %vm148_vm1 = vcmask 130048   ;;  %vm74_vm2 = vcmask 261120   ;;  %s486_s17 = smov 64  }
  0x39   :  { %327 = vmatprep.mubr.msk.f32.mxu1 %vm484_vm0, %v485_v1  ;;  %320 = vmatprep.mubr.msk.f32.mxu0 %vm484_vm0, %v485_v1  ;;  %v331_v5 = vpack.c.bf16 %v71_v3, %v70_v2  ;;  %v72_v7 = vld [vmem:[#allocation7 + $0x10] sm:$0xff]  ;;  %v73_v8 = vld [vmem:[#allocation7 + $0x18] sm:$0xff]  ;;  %v337_v9 = vpack.c.bf16 %v69_v6, %v68_v4  ;;  %v66_v11 = vld [vmem:[#allocation2] sm:$0x3]  ;;  %vm263_vm3 = vcmask 254976  }
  0x3a   :  { %v334_v10 = vpack.c.bf16 %v73_v8, %v72_v7  ;;  %v67_v12 = vld [vmem:[%s612_s4] sm:$0x3]  ;;  %s487_s4 = smov 32  }
  0x3b   :  { %332 = vmatpush3.bf16.msra.mxu0 %v331_v5  ;;  %338 = vmatpush3.bf16.msra.mxu1 %v337_v9  ;;  %v302_v16 = vld [vmem:[%s611_s3] ss:$0 sm:$0xff]  ;;  %s488_s3 = smov 96  }
  0x3c   :  { %333 = vmatprep.subr.bf16.mxu0 %v483_v0  ;;  %v237_v21 = vld [vmem:[%s613_s5] sm:$0x3]  ;;  %s489_s5 = smov [#allocation9]  }
  0x3d   :  { %s286_s20 = sshll.u32 %s489_s5, 4  ;;  %s287_s20 = int_to_ptr.vmem [resolvable:$true] %s286_s20 }
  0x3e   :  { %328 = vmatmul.mubr.msk.f32.vlgmr.msra.gmra.mrb[0].mxu1 %vm148_vm1, %v66_v11  ;;  %s426_s21 = scalar_lea.vmem %s287_s20, 32  ;;  %p431_p11 = scmp.lt.s32.totalorder %s287_s20, %s287_s20 }
  0x3f   :  { %335 = vmatpush3.bf16.msra.mxu0 %v334_v10  ;;  %p427_p10 = scmp.ne.s32.totalorder %s287_s20, %s426_s21  ;;  %p432_p12 = scmp.lt.s32.totalorder %s426_s21, %s426_s21 }
  0x41   :  { %p433_p13 = por %p432_p12, %p431_p11 }
  0x42   :  { %321 = vmatmul.mubr.msk.f32.vlgmr.msra.gmra.mrb[0].mxu0 %vm74_vm2, %v67_v12 }
  0x43   :  { %p434_p0 = pnand %p433_p13, %p427_p10 }
 0x111   :  { %v218_v13 = vpop.f32.mrb[0].mxu1 }
 0x112   :  { %v329_v14 = vpop.f32.mrb[1].mxu1 }
 0x115   :  { %v144_v15 = vpop.f32.mrb[0].mxu0 }
 0x116   :  { %v219_v17 = vadd.f32 %v218_v13, %v144_v15  ;;  %v322_v18 = vpop.f32.mrb[1].mxu0 }
 0x118   :  { %v229_v19 = vadd.f32 %v302_v16, %v219_v17 }
 0x11a   :  { %352 = vtanh.f32 %v229_v19  ;;  %v303_v22 = vmul.f32 -1.442695, %v229_v19 }
 0x11c   :  { %354 = vpow2.f32 %v303_v22 }
 0x124   :  { %v353_v20 = vpop.eup %352 }
 0x125   :  { %244 = vrot.lane.b32.xlu0 %v353_v20, %s486_s17 }
 0x126   :  { %v355_v23 = vpop.eup %354 }
 0x127   :  { %v233_v24 = vadd.f32 1.0, %v355_v23 }
 0x129   :  { %239 = vrot.lane.b32.xlu0 %v237_v21, %s487_s4  ;;  %356 = vrcp.f32 %v233_v24 }
 0x133   :  { %v357_v25 = vpop.eup %356 }
 0x197   :  { %v245_v26 = vpop.permute.xlu0 %244 }
 0x198   :  { %v247_v27 = vmul.f32 %v357_v25, %v245_v26 }
 0x19a   :  { %249 = vrot.lane.b32.xlu1 %v247_v27, %s487_s4 }
 0x19b   :  { %v240_v28 = vpop.permute.xlu0 %239 }
 0x19c   :  { %v242_v29 = vmul.f32 %v357_v25, %v240_v28 }
 0x20c   :  { %v250_v30 = vpop.permute.xlu1 %249 }
 0x20d   :  { %v252_v31 = vadd.f32 %v250_v30, %v242_v29 }
 0x20f   :  { %358 = vtanh.f32 %v252_v31 }
 0x219   :  { %v359_v32 = vpop.eup %358 }
 0x21a   :  { %255 = vrot.lane.b32.xlu1 %v359_v32, %s486_s17 }
 0x21e   :  { %266 = vrot.lane.b32.xlu1 %v252_v31, %s488_s3 }
 0x28c   :  { %v256_v33 = vpop.permute.xlu1 %255 }
 0x28d   :  { %v258_v34 = vmul.f32 %v357_v25, %v256_v33 }
 0x28f   :  { %260 = vrot.lane.b32.xlu0 %v258_v34, %s487_s4 }
 0x290   :  { %v267_v35 = vpop.permute.xlu1 %266 }
 0x291   :  { %269 = vst.msk [vmem:[#allocation9] sm:$0x3] %vm263_vm3, %v267_v35 }
 0x292   :  { %437 = shalt.err (!%p434_p0)
}
 0x293   :  { %s438_s24 = scalar_lea.hbm %s615_s7, 32 }
 0x294   :  { %p439_p1 = scmp.ne.s32.totalorder %s615_s7, %s438_s24  ;;  %p442_p2 = scmp.lt.u32.totalorder %s438_s24, %s615_s7 }
 0x296   :  { %p444_p3 = pnand %p442_p2, %p439_p1 }
 0x298   :  { %447 = shalt.err (!%p444_p3)
}
 0x299   :  { %289 = dma.vmem_to_hbm [thread:$0]  %s287_s20, 32, %s615_s7, [#allocation10]  }
 0x29a   :  { %s490_s30 = smov [#allocation8]  }
 0x29b   :  { %s276_s8 = sshll.u32 %s490_s30, 4  ;;  %s277_s8 = int_to_ptr.vmem [resolvable:$true] %s276_s8 }
 0x29c   :  { %s448_s9 = scalar_lea.vmem %s277_s8, 32  ;;  %p453_p5 = scmp.lt.s32.totalorder %s277_s8, %s277_s8 }
 0x29d   :  { %p449_p4 = scmp.ne.s32.totalorder %s277_s8, %s448_s9  ;;  %p454_p6 = scmp.lt.s32.totalorder %s448_s9, %s448_s9 }
 0x29f   :  { %p455_p7 = por %p454_p6, %p453_p5 }
 0x2a1   :  { %p456_p8 = pnand %p455_p7, %p449_p4 }
 0x301   :  { %v261_v36 = vpop.permute.xlu0 %260 }
 0x302   :  { %264 = vst.msk [vmem:[#allocation8] sm:$0x3] %vm263_vm3, %v261_v36 }
 0x303   :  { %459 = shalt.err (!%p456_p8)
}
 0x304   :  { %s460_s14 = scalar_lea.hbm %s614_s6, 32 }
 0x305   :  { %p461_p9 = scmp.ne.s32.totalorder %s614_s6, %s460_s14  ;;  %p464_p10 = scmp.lt.u32.totalorder %s460_s14, %s614_s6 }
 0x307   :  { %p466_p11 = pnand %p464_p10, %p461_p9 }
 0x309   :  { %469 = shalt.err (!%p466_p11)
}
 0x30a   :  { %279 = dma.vmem_to_hbm [thread:$0]  %s277_s8, 32, %s614_s6, [#allocation4]  }
 0x30b   :  { %474 = dma.done.wait [#allocation4], 32  }
 0x30c   :  { %475 = vsyncadd [#allocation4], 4294967264 }
 0x30d   :  { %476 = dma.done.wait [#allocation10], 32  }
 0x30e   :  { %477 = vsyncadd [#allocation10], 4294967264 }
 0x30f   :  { %296 = vsyncpa [#allocation3], 1 }
 0x310   :  { %297 = vsyncpa [#allocation6], 1 }
 0x311   :  { %298 = vsyncpa [#allocation4], 1 }
 0x312   :  { %299 = vsyncpa [#allocation10], 1 }

</bundles_post_ra>
